<compile_context>
chip_gen: v5e
topology: v5e:2x2
jax: 0.10.0
libtpu: 0.0.40
codegen_flags: <defaults>
</compile_context>

<pallas_src>
import jax
import jax.numpy as jnp
from jax.experimental import pallas as pl
from jax.experimental.pallas import tpu as pltpu


def _round_up(x: int, m: int) -> int:
    return (x + m - 1) // m * m


def cls_linear_kernel(cls_t_ref, w_ref, o_ref):
    """Project CLS vectors with the linear head using VPU + XLU only.

    cls_t_ref: [H, TN]  CLS vectors, hidden on sublanes / questions on lanes
    w_ref:     [H, 1]   linear projection weight (torch.rand(768, 1) analogue)
    o_ref:     [1, TN]  lane-dense logits for this tile of questions
    """
    # Per-lane multiply: the [H, 1] weight column broadcasts across lanes (VPU).
    prod = cls_t_ref[...] * w_ref[...]                        # [H, TN]
    # Cross-sublane reduction over the hidden axis (XLU). The result is already
    # lane-dense, so the store is a full-width vst rather than a masked one.
    o_ref[...] = jnp.sum(prod, axis=0, keepdims=True).astype(o_ref.dtype)


def qa_head_forward(hidden_states: jax.Array, linear_w: jax.Array,
                    *, block_n: int = 512) -> jax.Array:
    """CLS pooling + linear head of QAModel.forward.

    hidden_states: [N, S, H] per-question BERT last_hidden_state
    linear_w:      [H, 1]    projection weight
    returns:       [N, 1]    logits (== pred_tensor @ linear, squeezed)
    """
    N, S, H = hidden_states.shape
    assert linear_w.shape == (H, 1)
    assert H % 128 == 0, "hidden size must be lane-aligned"

    # CLS pooling + layout plumbing in the wrapper: only the [N, H] CLS slab
    # crosses HBM->VMEM (S x less traffic than shipping the full activation),
    # presented hidden-on-sublanes / questions-on-lanes so the kernel's output
    # slab is lane-dense.
    cls_t = jnp.transpose(hidden_states[:, 0, :])             # [H, N]

    # Tile over questions. Each block's last dim must be a multiple of 128 or
    # span the whole (padded) question axis.
    if N <= block_n:
        tn, n_pad = N, N
    else:
        tn = block_n                                          # multiple of 128
        n_pad = _round_up(N, tn)
        cls_t = jnp.pad(cls_t, ((0, 0), (0, n_pad - N)))
    grid_n = n_pad // tn

    out = pl.pallas_call(
        cls_linear_kernel,
        out_shape=jax.ShapeDtypeStruct((1, n_pad), jnp.float32),
        grid=(grid_n,),
        in_specs=[
            pl.BlockSpec((H, tn), lambda i: (0, i)),          # CLS tile
            pl.BlockSpec((H, 1), lambda i: (0, 0)),           # weight (resident)
        ],
        out_specs=pl.BlockSpec((1, tn), lambda i: (0, i)),
        compiler_params=pltpu.CompilerParams(
            dimension_semantics=("parallel",),   # shard N-tiles across TCs (v7x)
            vmem_limit_bytes=32 * 1024 * 1024,   # headroom for double-buffering
        ),
    )(cls_t, linear_w)

    return out[0, :N].reshape(N, 1)


def qa_inference(hidden_states: jax.Array, linear_w: jax.Array) -> jax.Array:
    """Mirror of QAModel.inference.

    argmax over dim 1 of a [N, 1] tensor is always 0 (size-1 axis); keep it as
    a trivial wrapper-side op rather than a second kernel launch.
    """
    x = qa_head_forward(hidden_states, linear_w)
    return jnp.argmax(x, axis=1)


if __name__ == "__main__":
    # Small shapes consistent with the forward pass: N questions, seq S,
    # BERT hidden size H = 768.
    N, S, H = 8, 8, 768

    key = jax.random.PRNGKey(0)
    k_h, k_w = jax.random.split(key)

    # TODO(synk): the pretrained BERT encoder + HF tokenizer (string inputs,
    # checkpoint weights) have no in-script Pallas equivalent; their
    # last_hidden_state is synthesized deterministically here.
    hidden_states = jax.random.normal(k_h, (N, S, H), dtype=jnp.float32)

    # Deterministic analogue of `self.linear = torch.rand(768, 1)`.
    linear_w = jax.random.uniform(k_w, (H, 1), dtype=jnp.float32)

    out = jax.block_until_ready(qa_head_forward(hidden_states, linear_w))

    # Pure-JAX reference for correctness.
    ref = hidden_states[:, 0, :] @ linear_w                   # [N, 1]
    assert out.shape == (N, 1), out.shape
    assert jnp.allclose(out, ref, atol=1e-4, rtol=1e-4), "mismatch vs reference"

    # Exercise the inference path too (argmax over the size-1 dim -> all 0).
    val = jax.block_until_ready(qa_inference(hidden_states, linear_w))
    assert val.shape == (N,), val.shape
    assert jnp.all(val == 0)

    print("KERNEL_OK")
</pallas_src>

<mosaic_0001>
module attributes {stable_mosaic.version = 11 : i64} {
  func.func @cls_linear_kernel(%arg0: i32, %arg1: memref<768x8xf32, #tpu.memory_space<vmem>>, %arg2: memref<768x1xf32, #tpu.memory_space<vmem>>, %arg3: memref<1x8xf32, #tpu.memory_space<vmem>>) attributes {dimension_semantics = [#tpu.dimension_semantics<parallel>], iteration_bounds = array<i64: 1>, scalar_prefetch = 0 : i64, scratch_operands = 0 : i64, tpu.core_type = #tpu.core_type<tc>, window_params = [{transform_indices = @transform_0, window_bounds = array<i64: 768, 8>}, {pipeline_mode = #tpu.pipeline_mode<synchronous>, transform_indices = @transform_1, window_bounds = array<i64: 768, 1>}, {transform_indices = @transform_2, window_bounds = array<i64: 1, 8>}]} {
    %c0 = arith.constant 0 : index
    %c0_0 = arith.constant 0 : index
    %0 = vector.load %arg1[%c0, %c0_0] : memref<768x8xf32, #tpu.memory_space<vmem>>, vector<768x8xf32>
    %c0_1 = arith.constant 0 : index
    %c0_2 = arith.constant 0 : index
    %1 = vector.load %arg2[%c0_1, %c0_2] : memref<768x1xf32, #tpu.memory_space<vmem>>, vector<768x1xf32>
    %2 = vector.broadcast %1 : vector<768x1xf32> to vector<768x8xf32>
    %3 = arith.mulf %0, %2 : vector<768x8xf32>
    %cst = arith.constant dense<0.000000e+00> : vector<8xf32>
    %4 = vector.multi_reduction <add>, %3, %cst [0] : vector<768x8xf32> to vector<8xf32>
    %5 = vector.shape_cast %4 : vector<8xf32> to vector<1x8xf32>
    %c0_3 = arith.constant 0 : index
    %c0_4 = arith.constant 0 : index
    %6 = vector.load %arg3[%c0_3, %c0_4] : memref<1x8xf32, #tpu.memory_space<vmem>>, vector<1x8xf32>
    tpu.vector_store %arg3[%c0_3, %c0_4], %5 {strides = array<i32>} : memref<1x8xf32, #tpu.memory_space<vmem>>, vector<1x8xf32>,
    return
  }
  func.func @transform_0(%arg0: i32) -> (i32, i32) {
    %c0_i32 = arith.constant 0 : i32
    %c0_i32_0 = arith.constant 0 : i32
    return %c0_i32, %arg0 : i32, i32
  }
  func.func @transform_1(%arg0: i32) -> (i32, i32) {
    %c0_i32 = arith.constant 0 : i32
    %c0_i32_0 = arith.constant 0 : i32
    %c0_i32_1 = arith.constant 0 : i32
    return %c0_i32, %c0_i32_0 : i32, i32
  }
  func.func @transform_2(%arg0: i32) -> (i32, i32) {
    %c0_i32 = arith.constant 0 : i32
    %c0_i32_0 = arith.constant 0 : i32
    return %c0_i32, %arg0 : i32, i32
  }
}

</mosaic_0001>

<bundles_post_ra>
// kernel: tpu_custom_call.1
= control target key start
LH: loop header
LB: loop body
LE: loop exit
PB: predicated region body
PF: predicated region fallthrough
CT: control target
= control target key end

     0   :  { %v1027_v3 = vmov 0   ;;  %s1767_s0 = inlined_call_operand.vmem [shape: f32[768,8], index: 0, kind: input, shape index: {}]   ;;  %s1768_s1 = inlined_call_operand.vmem [shape: f32[768,1], index: 1, kind: input, shape index: {}]   ;;  %s1769_s2 = inlined_call_operand.hbm [shape: f32[1,8], index: 2, kind: output, shape index: {}]  }
   0x1   :  { %v112_v0 = vld [vmem:[%s1768_s1 + $0x20] sm:$0xff]  ;;  %v110_v1 = vld [vmem:[%s1768_s1 + $0x10] sm:$0xff]  ;;  %1000 = vset.pattern.permute.xlu2 %v1027_v3  ;;  %999 = vset.pattern.permute.xlu1 %v1027_v3 }
   0x2   :  { %v108_v2 = vld [vmem:[%s1768_s1] sm:$0xff]  ;;  %998 = vset.pattern.permute.xlu0 %v1027_v3  ;;  %226 = vperm.xlu2 %1000, %v112_v0  }
   0x3   :  { %216 = vperm.xlu1 %999, %v110_v1   ;;  %206 = vperm.xlu0 %998, %v108_v2  }
   0x4   :  { %7 = vsyncpa [#allocation3], 0  ;;  %v113_v4 = vld [vmem:[%s1768_s1 + $0x28] sm:$0xff]  ;;  %v111_v5 = vld [vmem:[%s1768_s1 + $0x18] sm:$0xff]  ;;  %vm780_vm0 = vcmask 64512   ;;  %s987_s28 = sshll.u32 %s1769_s2, 4  ;;  %s988_s28 = int_to_ptr.hbm [resolvable:$true] %s987_s28 }
   0x5   :  { %v109_v6 = vld [vmem:[%s1768_s1 + $0x8] sm:$0xff]  ;;  %v116_v7 = vld [vmem:[%s1768_s1 + $0x40] sm:$0xff]  ;;  %v115_v8 = vld [vmem:[%s1768_s1 + $0x38] sm:$0xff]  ;;  %vm978_vm1 = vcmask 57344  }
   0x6   :  { %v114_v9 = vld [vmem:[%s1768_s1 + $0x30] sm:$0xff]  ;;  %v119_v10 = vld [vmem:[%s1768_s1 + $0x58] sm:$0xff]  ;;  %v117_v12 = vld [vmem:[%s1768_s1 + $0x48] sm:$0xff] }
   0x7   :  { %v118_v11 = vld [vmem:[%s1768_s1 + $0x50] sm:$0xff]  ;;  %v121_v14 = vld [vmem:[%s1768_s1 + $0x68] sm:$0xff]  ;;  %v120_v15 = vld [vmem:[%s1768_s1 + $0x60] sm:$0xff] }
   0x8   :  { %v122_v13 = vld [vmem:[%s1768_s1 + $0x70] sm:$0xff]  ;;  %v125_v16 = vld [vmem:[%s1768_s1 + $0x88] sm:$0xff]  ;;  %v124_v17 = vld [vmem:[%s1768_s1 + $0x80] sm:$0xff] }
   0x9   :  { %v123_v18 = vld [vmem:[%s1768_s1 + $0x78] sm:$0xff]  ;;  %v128_v19 = vld [vmem:[%s1768_s1 + $0xa0] sm:$0xff]  ;;  %v126_v21 = vld [vmem:[%s1768_s1 + $0x90] sm:$0xff] }
   0xa   :  { %231 = vperm.xlu2 %1000, %v113_v4   ;;  %v127_v20 = vld [vmem:[%s1768_s1 + $0x98] sm:$0xff]  ;;  %v130_v23 = vld [vmem:[%s1768_s1 + $0xb0] sm:$0xff]  ;;  %v129_v24 = vld [vmem:[%s1768_s1 + $0xa8] sm:$0xff] }
   0xb   :  { %221 = vperm.xlu1 %999, %v111_v5   ;;  %211 = vperm.xlu0 %998, %v109_v6   ;;  %v131_v22 = vld [vmem:[%s1768_s1 + $0xb8] sm:$0xff]  ;;  %v134_v25 = vld [vmem:[%s1768_s1 + $0xd0] sm:$0xff]  ;;  %v133_v26 = vld [vmem:[%s1768_s1 + $0xc8] sm:$0xff] }
   0xc   :  { %v132_v27 = vld [vmem:[%s1768_s1 + $0xc0] sm:$0xff]  ;;  %v137_v28 = vld [vmem:[%s1768_s1 + $0xe8] sm:$0xff]  ;;  %v135_v30 = vld [vmem:[%s1768_s1 + $0xd8] sm:$0xff] }
   0xd   :  { %v136_v29 = vld [vmem:[%s1768_s1 + $0xe0] sm:$0xff]  ;;  %v139_v32 = vld [vmem:[%s1768_s1 + $0xf8] sm:$0xff]  ;;  %v138_v33 = vld [vmem:[%s1768_s1 + $0xf0] sm:$0xff] }
   0xe   :  { %v140_v31 = vld [vmem:[%s1768_s1 + $0x100] sm:$0xff]  ;;  %v143_v34 = vld [vmem:[%s1768_s1 + $0x118] sm:$0xff]  ;;  %v142_v35 = vld [vmem:[%s1768_s1 + $0x110] sm:$0xff] }
   0xf   :  { %v141_v36 = vld [vmem:[%s1768_s1 + $0x108] sm:$0xff]  ;;  %v146_v38 = vld [vmem:[%s1768_s1 + $0x130] sm:$0xff]  ;;  %v144_v40 = vld [vmem:[%s1768_s1 + $0x120] sm:$0xff] }
  0x10   :  { %v145_v39 = vld [vmem:[%s1768_s1 + $0x128] sm:$0xff]  ;;  %v148_v43 = vld [vmem:[%s1768_s1 + $0x140] sm:$0xff]  ;;  %v147_v44 = vld [vmem:[%s1768_s1 + $0x138] sm:$0xff] }
  0x11   :  { %v149_v42 = vld [vmem:[%s1768_s1 + $0x148] sm:$0xff]  ;;  %v152_v46 = vld [vmem:[%s1768_s1 + $0x160] sm:$0xff]  ;;  %v151_v47 = vld [vmem:[%s1768_s1 + $0x158] sm:$0xff] }
  0x12   :  { %246 = vperm.xlu2 %1000, %v116_v7   ;;  %v150_v48 = vld [vmem:[%s1768_s1 + $0x150] sm:$0xff]  ;;  %v155_v52 = vld [vmem:[%s1768_s1 + $0x178] sm:$0xff]  ;;  %v153_v54 = vld [vmem:[%s1768_s1 + $0x168] sm:$0xff] }
  0x13   :  { %241 = vperm.xlu1 %999, %v115_v8   ;;  %236 = vperm.xlu0 %998, %v114_v9   ;;  %v154_v53 = vld [vmem:[%s1768_s1 + $0x170] sm:$0xff]  ;;  %v12_v55 = vld [vmem:[%s1767_s0] sm:$0xff]  ;;  %v13_v57 = vld [vmem:[%s1767_s0 + $0x8] sm:$0xff] }
  0x14   :  { %v14_v56 = vld [vmem:[%s1767_s0 + $0x10] sm:$0xff]  ;;  %v15_v61 = vld [vmem:[%s1767_s0 + $0x18] sm:$0xff]  ;;  %v16_v1 = vld [vmem:[%s1767_s0 + $0x20] sm:$0xff] }
  0x15   :  { %v158_v2 = vld [vmem:[%s1768_s1 + $0x190] sm:$0xff]  ;;  %v157_v6 = vld [vmem:[%s1768_s1 + $0x188] sm:$0xff]  ;;  %v156_v7 = vld [vmem:[%s1768_s1 + $0x180] sm:$0xff] }
  0x16   :  { %v17_v8 = vld [vmem:[%s1767_s0 + $0x28] sm:$0xff] }
  0x1a   :  { %261 = vperm.xlu2 %1000, %v119_v10  }
  0x1b   :  { %256 = vperm.xlu1 %999, %v118_v11   ;;  %251 = vperm.xlu0 %998, %v117_v12  }
  0x22   :  { %276 = vperm.xlu2 %1000, %v122_v13   ;;  %v18_v13 = vld [vmem:[%s1767_s0 + $0x30] sm:$0xff] }
  0x23   :  { %271 = vperm.xlu1 %999, %v121_v14   ;;  %266 = vperm.xlu0 %998, %v120_v15  }
  0x2a   :  { %291 = vperm.xlu2 %1000, %v125_v16  }
  0x2b   :  { %286 = vperm.xlu1 %999, %v124_v17   ;;  %281 = vperm.xlu0 %998, %v123_v18  }
  0x32   :  { %306 = vperm.xlu2 %1000, %v128_v19   ;;  %v19_v19 = vld [vmem:[%s1767_s0 + $0x38] sm:$0xff] }
  0x33   :  { %301 = vperm.xlu1 %999, %v127_v20   ;;  %296 = vperm.xlu0 %998, %v126_v21  }
  0x3a   :  { %321 = vperm.xlu2 %1000, %v131_v22  }
  0x3b   :  { %316 = vperm.xlu1 %999, %v130_v23   ;;  %311 = vperm.xlu0 %998, %v129_v24   ;;  %v20_v23 = vld [vmem:[%s1767_s0 + $0x40] sm:$0xff] }
  0x42   :  { %336 = vperm.xlu2 %1000, %v134_v25   ;;  %v161_v25 = vld [vmem:[%s1768_s1 + $0x1a8] sm:$0xff] }
  0x43   :  { %331 = vperm.xlu1 %999, %v133_v26   ;;  %326 = vperm.xlu0 %998, %v132_v27  }
  0x4a   :  { %351 = vperm.xlu2 %1000, %v137_v28   ;;  %v160_v28 = vld [vmem:[%s1768_s1 + $0x1a0] sm:$0xff] }
  0x4b   :  { %346 = vperm.xlu1 %999, %v136_v29   ;;  %341 = vperm.xlu0 %998, %v135_v30   ;;  %v159_v29 = vld [vmem:[%s1768_s1 + $0x198] sm:$0xff] }
  0x52   :  { %366 = vperm.xlu2 %1000, %v140_v31  }
  0x53   :  { %361 = vperm.xlu1 %999, %v139_v32   ;;  %356 = vperm.xlu0 %998, %v138_v33  }
  0x5a   :  { %381 = vperm.xlu2 %1000, %v143_v34   ;;  %v22_v34 = vld [vmem:[%s1767_s0 + $0x50] sm:$0xff] }
  0x5b   :  { %376 = vperm.xlu1 %999, %v142_v35   ;;  %371 = vperm.xlu0 %998, %v141_v36   ;;  %v21_v35 = vld [vmem:[%s1767_s0 + $0x48] sm:$0xff] }
  0x5c   :  { %v227_v37 = vpop.permute.xlu2 %226 }
  0x5d   :  { %v688_v10 = vmul.f32 %v227_v37, %v16_v1  ;;  %v167_v1 = vld [vmem:[%s1768_s1 + $0x1d8] sm:$0xff] }
  0x5f   :  { %v788_v21 = vsel %vm780_vm0, %v688_v10, 0.0  ;;  %v27_v10 = vld [vmem:[%s1767_s0 + $0x78] sm:$0xff] }
  0x62   :  { %396 = vperm.xlu2 %1000, %v146_v38  }
  0x63   :  { %391 = vperm.xlu1 %999, %v145_v39   ;;  %386 = vperm.xlu0 %998, %v144_v40  }
  0x64   :  { %v232_v41 = vpop.permute.xlu2 %231 }
  0x65   :  { %v689_v14 = vmul.f32 %v232_v41, %v17_v8 }
  0x67   :  { %v790_v26 = vsel %vm780_vm0, %v689_v14, 0.0 }
  0x6a   :  { %411 = vperm.xlu2 %1000, %v149_v42  }
  0x6b   :  { %406 = vperm.xlu1 %999, %v148_v43   ;;  %401 = vperm.xlu0 %998, %v147_v44   ;;  %v23_v44 = vld [vmem:[%s1767_s0 + $0x58] sm:$0xff] }
  0x6c   :  { %v247_v45 = vpop.permute.xlu2 %246 }
  0x6d   :  { %v692_v31 = vmul.f32 %v247_v45, %v20_v23 }
  0x6f   :  { %v796_v41 = vsel %vm780_vm0, %v692_v31, 0.0 }
  0x72   :  { %426 = vperm.xlu2 %1000, %v152_v46   ;;  %v164_v46 = vld [vmem:[%s1768_s1 + $0x1c0] sm:$0xff] }
  0x73   :  { %421 = vperm.xlu1 %999, %v151_v47   ;;  %416 = vperm.xlu0 %998, %v150_v48   ;;  %v163_v48 = vld [vmem:[%s1768_s1 + $0x1b8] sm:$0xff] }
  0x74   :  { %v1179_v49 = vpop.permute.xlu2 %261 }
  0x75   :  { %v217_v50 = vpop.permute.xlu1 %216  ;;  %v207_v51 = vpop.permute.xlu0 %206 }
  0x76   :  { %v684_v58 = vmul.f32 %v207_v51, %v12_v55  ;;  %v686_v63 = vmul.f32 %v217_v50, %v14_v56  ;;  %v162_v50 = vld [vmem:[%s1768_s1 + $0x1b0] sm:$0xff]  ;;  %v25_v55 = vld [vmem:[%s1767_s0 + $0x68] sm:$0xff]  ;;  %v24_v56 = vld [vmem:[%s1767_s0 + $0x60] sm:$0xff] }
  0x78   :  { %v781_v3 = vsel %vm780_vm0, %v684_v58, 0.0  ;;  %v784_v11 = vsel %vm780_vm0, %v686_v63, 0.0  ;;  %v26_v63 = vld [vmem:[%s1767_s0 + $0x70] sm:$0xff] }
  0x7a   :  { %441 = vperm.xlu2 %1000, %v155_v52   ;;  %v695_v52 = vmul.f32 %v1179_v49, %v23_v44 }
  0x7b   :  { %436 = vperm.xlu1 %999, %v154_v53   ;;  %431 = vperm.xlu0 %998, %v153_v54  }
  0x7c   :  { %v1199_v59 = vpop.permute.xlu2 %276  ;;  %v802_v49 = vsel %vm780_vm0, %v695_v52, 0.0 }
  0x7d   :  { %v222_v60 = vpop.permute.xlu1 %221  ;;  %v212_v62 = vpop.permute.xlu0 %211 }
  0x7e   :  { %v685_v0 = vmul.f32 %v212_v62, %v13_v57  ;;  %v687_v4 = vmul.f32 %v222_v60, %v15_v61 }
  0x80   :  { %v782_v5 = vsel %vm780_vm0, %v685_v0, 0.0  ;;  %v786_v15 = vsel %vm780_vm0, %v687_v4, 0.0  ;;  %v165_v4 = vld [vmem:[%s1768_s1 + $0x1c8] sm:$0xff] }
  0x81   :  { %v783_v9 = vadd.f32 %v782_v5, %v781_v3  ;;  %v166_v3 = vld [vmem:[%s1768_s1 + $0x1d0] sm:$0xff] }
  0x82   :  { %456 = vperm.xlu2 %1000, %v158_v2  }
  0x83   :  { %v785_v12 = vadd.f32 %v784_v11, %v783_v9  ;;  %451 = vperm.xlu1 %999, %v157_v6   ;;  %446 = vperm.xlu0 %998, %v156_v7   ;;  %v698_v6 = vmul.f32 %v1199_v59, %v26_v63  ;;  %v28_v9 = vld [vmem:[%s1767_s0 + $0x80] sm:$0xff] }
  0x84   :  { %v1226_v16 = vpop.permute.xlu2 %291 }
  0x85   :  { %v787_v17 = vadd.f32 %v786_v15, %v785_v12  ;;  %v242_v18 = vpop.permute.xlu1 %241  ;;  %v237_v20 = vpop.permute.xlu0 %236  ;;  %v808_v59 = vsel %vm780_vm0, %v698_v6, 0.0 }
  0x86   :  { %v690_v22 = vmul.f32 %v237_v20, %v18_v13  ;;  %v691_v27 = vmul.f32 %v242_v18, %v19_v19  ;;  %v170_v19 = vld [vmem:[%s1768_s1 + $0x1f0] sm:$0xff] }
  0x87   :  { %v789_v24 = vadd.f32 %v788_v21, %v787_v17  ;;  %v29_v17 = vld [vmem:[%s1767_s0 + $0x88] sm:$0xff] }
  0x88   :  { %v792_v32 = vsel %vm780_vm0, %v690_v22, 0.0  ;;  %v794_v36 = vsel %vm780_vm0, %v691_v27, 0.0  ;;  %v169_v21 = vld [vmem:[%s1768_s1 + $0x1e8] sm:$0xff]  ;;  %v168_v22 = vld [vmem:[%s1768_s1 + $0x1e0] sm:$0xff]  ;;  %v31_v27 = vld [vmem:[%s1767_s0 + $0x98] sm:$0xff] }
  0x89   :  { %v791_v30 = vadd.f32 %v790_v26, %v789_v24  ;;  %v701_v24 = vmul.f32 %v1226_v16, %v29_v17 }
  0x8a   :  { %471 = vperm.xlu2 %1000, %v161_v25  }
  0x8b   :  { %v793_v33 = vadd.f32 %v792_v32, %v791_v30  ;;  %466 = vperm.xlu1 %999, %v160_v28   ;;  %461 = vperm.xlu0 %998, %v159_v29   ;;  %v30_v28 = vld [vmem:[%s1767_s0 + $0x90] sm:$0xff]  ;;  %v814_v16 = vsel %vm780_vm0, %v701_v24, 0.0 }
  0x8c   :  { %v1253_v37 = vpop.permute.xlu2 %306 }
  0x8d   :  { %v795_v38 = vadd.f32 %v794_v36, %v793_v33  ;;  %v257_v39 = vpop.permute.xlu1 %256  ;;  %v252_v40 = vpop.permute.xlu0 %251  ;;  %v173_v36 = vld [vmem:[%s1768_s1 + $0x208] sm:$0xff] }
  0x8e   :  { %v694_v42 = vmul.f32 %v257_v39, %v22_v34  ;;  %v693_v43 = vmul.f32 %v252_v40, %v21_v35  ;;  %v32_v34 = vld [vmem:[%s1767_s0 + $0xa0] sm:$0xff]  ;;  %v171_v40 = vld [vmem:[%s1768_s1 + $0x1f8] sm:$0xff] }
  0x8f   :  { %v797_v45 = vadd.f32 %v796_v41, %v795_v38  ;;  %v172_v39 = vld [vmem:[%s1768_s1 + $0x200] sm:$0xff] }
  0x90   :  { %v798_v47 = vsel %vm780_vm0, %v693_v43, 0.0  ;;  %v800_v53 = vsel %vm780_vm0, %v694_v42, 0.0  ;;  %v704_v42 = vmul.f32 %v1253_v37, %v32_v34 }
  0x91   :  { %v799_v51 = vadd.f32 %v798_v47, %v797_v45  ;;  %v34_v45 = vld [vmem:[%s1767_s0 + $0xb0] sm:$0xff] }
  0x92   :  { %486 = vperm.xlu2 %1000, %v164_v46   ;;  %v33_v46 = vld [vmem:[%s1767_s0 + $0xa8] sm:$0xff]  ;;  %v820_v37 = vsel %vm780_vm0, %v704_v42, 0.0 }
  0x93   :  { %v801_v54 = vadd.f32 %v800_v53, %v799_v51  ;;  %481 = vperm.xlu1 %999, %v163_v48   ;;  %476 = vperm.xlu0 %998, %v162_v50   ;;  %v35_v53 = vld [vmem:[%s1767_s0 + $0xb8] sm:$0xff] }
  0x94   :  { %v1277_v57 = vpop.permute.xlu2 %321 }
  0x95   :  { %v272_v58 = vpop.permute.xlu1 %271  ;;  %v267_v60 = vpop.permute.xlu0 %266  ;;  %v803_v0 = vadd.f32 %v802_v49, %v801_v54 }
  0x96   :  { %v697_v61 = vmul.f32 %v272_v58, %v25_v55  ;;  %v696_v62 = vmul.f32 %v267_v60, %v24_v56  ;;  %v176_v55 = vld [vmem:[%s1768_s1 + $0x220] sm:$0xff]  ;;  %v175_v58 = vld [vmem:[%s1768_s1 + $0x218] sm:$0xff]  ;;  %v174_v60 = vld [vmem:[%s1768_s1 + $0x210] sm:$0xff] }
  0x98   :  { %v804_v2 = vsel %vm780_vm0, %v696_v62, 0.0  ;;  %v806_v7 = vsel %vm780_vm0, %v697_v61, 0.0  ;;  %v707_v61 = vmul.f32 %v1277_v57, %v35_v53 }
  0x99   :  { %v805_v5 = vadd.f32 %v804_v2, %v803_v0  ;;  %v37_v0 = vld [vmem:[%s1767_s0 + $0xc8] sm:$0xff] }
  0x9a   :  { %501 = vperm.xlu2 %1000, %v167_v1   ;;  %v36_v1 = vld [vmem:[%s1767_s0 + $0xc0] sm:$0xff]  ;;  %v826_v57 = vsel %vm780_vm0, %v707_v61, 0.0 }
  0x9b   :  { %v807_v8 = vadd.f32 %v806_v7, %v805_v5  ;;  %496 = vperm.xlu1 %999, %v166_v3   ;;  %491 = vperm.xlu0 %998, %v165_v4   ;;  %v38_v7 = vld [vmem:[%s1767_s0 + $0xd0] sm:$0xff] }
  0x9c   :  { %v1301_v11 = vpop.permute.xlu2 %336 }
  0x9d   :  { %v287_v12 = vpop.permute.xlu1 %286  ;;  %v282_v13 = vpop.permute.xlu0 %281  ;;  %v809_v18 = vadd.f32 %v808_v59, %v807_v8 }
  0x9e   :  { %v700_v14 = vmul.f32 %v287_v12, %v28_v9  ;;  %v699_v15 = vmul.f32 %v282_v13, %v27_v10  ;;  %v179_v9 = vld [vmem:[%s1768_s1 + $0x238] sm:$0xff]  ;;  %v178_v12 = vld [vmem:[%s1768_s1 + $0x230] sm:$0xff]  ;;  %v177_v13 = vld [vmem:[%s1768_s1 + $0x228] sm:$0xff] }
  0xa0   :  { %v810_v20 = vsel %vm780_vm0, %v699_v15, 0.0  ;;  %v812_v25 = vsel %vm780_vm0, %v700_v14, 0.0  ;;  %v710_v14 = vmul.f32 %v1301_v11, %v38_v7 }
  0xa1   :  { %v811_v23 = vadd.f32 %v810_v20, %v809_v18  ;;  %v40_v18 = vld [vmem:[%s1767_s0 + $0xe0] sm:$0xff] }
  0xa2   :  { %516 = vperm.xlu2 %1000, %v170_v19   ;;  %v39_v19 = vld [vmem:[%s1767_s0 + $0xd8] sm:$0xff]  ;;  %v832_v11 = vsel %vm780_vm0, %v710_v14, 0.0 }
  0xa3   :  { %v813_v26 = vadd.f32 %v812_v25, %v811_v23  ;;  %511 = vperm.xlu1 %999, %v169_v21   ;;  %506 = vperm.xlu0 %998, %v168_v22   ;;  %v41_v25 = vld [vmem:[%s1767_s0 + $0xe8] sm:$0xff] }
  0xa4   :  { %v1325_v29 = vpop.permute.xlu2 %351 }
  0xa5   :  { %v302_v30 = vpop.permute.xlu1 %301  ;;  %v297_v31 = vpop.permute.xlu0 %296  ;;  %v815_v35 = vadd.f32 %v814_v16, %v813_v26 }
  0xa6   :  { %v703_v32 = vmul.f32 %v302_v30, %v31_v27  ;;  %v702_v33 = vmul.f32 %v297_v31, %v30_v28  ;;  %v182_v27 = vld [vmem:[%s1768_s1 + $0x250] sm:$0xff]  ;;  %v181_v30 = vld [vmem:[%s1768_s1 + $0x248] sm:$0xff]  ;;  %v180_v31 = vld [vmem:[%s1768_s1 + $0x240] sm:$0xff] }
  0xa8   :  { %v816_v38 = vsel %vm780_vm0, %v702_v33, 0.0  ;;  %v818_v43 = vsel %vm780_vm0, %v703_v32, 0.0  ;;  %v713_v32 = vmul.f32 %v1325_v29, %v41_v25 }
  0xa9   :  { %v817_v41 = vadd.f32 %v816_v38, %v815_v35  ;;  %v43_v35 = vld [vmem:[%s1767_s0 + $0xf8] sm:$0xff] }
  0xaa   :  { %531 = vperm.xlu2 %1000, %v173_v36   ;;  %v42_v36 = vld [vmem:[%s1767_s0 + $0xf0] sm:$0xff]  ;;  %v838_v29 = vsel %vm780_vm0, %v713_v32, 0.0 }
  0xab   :  { %v819_v44 = vadd.f32 %v818_v43, %v817_v41  ;;  %526 = vperm.xlu1 %999, %v172_v39   ;;  %521 = vperm.xlu0 %998, %v171_v40   ;;  %v44_v43 = vld [vmem:[%s1767_s0 + $0x100] sm:$0xff] }
  0xac   :  { %v1349_v47 = vpop.permute.xlu2 %366 }
  0xad   :  { %v317_v48 = vpop.permute.xlu1 %316  ;;  %v312_v50 = vpop.permute.xlu0 %311  ;;  %v821_v54 = vadd.f32 %v820_v37, %v819_v44 }
  0xae   :  { %v706_v51 = vmul.f32 %v317_v48, %v34_v45  ;;  %v705_v52 = vmul.f32 %v312_v50, %v33_v46  ;;  %v185_v45 = vld [vmem:[%s1768_s1 + $0x268] sm:$0xff]  ;;  %v184_v48 = vld [vmem:[%s1768_s1 + $0x260] sm:$0xff]  ;;  %v183_v50 = vld [vmem:[%s1768_s1 + $0x258] sm:$0xff] }
  0xb0   :  { %v822_v56 = vsel %vm780_vm0, %v705_v52, 0.0  ;;  %v824_v62 = vsel %vm780_vm0, %v706_v51, 0.0  ;;  %v716_v51 = vmul.f32 %v1349_v47, %v44_v43 }
  0xb1   :  { %v823_v49 = vadd.f32 %v822_v56, %v821_v54  ;;  %v46_v54 = vld [vmem:[%s1767_s0 + $0x110] sm:$0xff] }
  0xb2   :  { %546 = vperm.xlu2 %1000, %v176_v55   ;;  %v45_v55 = vld [vmem:[%s1767_s0 + $0x108] sm:$0xff]  ;;  %v844_v47 = vsel %vm780_vm0, %v716_v51, 0.0 }
  0xb3   :  { %v825_v63 = vadd.f32 %v824_v62, %v823_v49  ;;  %541 = vperm.xlu1 %999, %v175_v58   ;;  %536 = vperm.xlu0 %998, %v174_v60   ;;  %v47_v62 = vld [vmem:[%s1767_s0 + $0x118] sm:$0xff] }
  0xb4   :  { %v1373_v2 = vpop.permute.xlu2 %381 }
  0xb5   :  { %v332_v3 = vpop.permute.xlu1 %331  ;;  %v327_v4 = vpop.permute.xlu0 %326  ;;  %v827_v8 = vadd.f32 %v826_v57, %v825_v63 }
  0xb6   :  { %v709_v5 = vmul.f32 %v332_v3, %v37_v0  ;;  %v708_v6 = vmul.f32 %v327_v4, %v36_v1  ;;  %v188_v0 = vld [vmem:[%s1768_s1 + $0x280] sm:$0xff]  ;;  %v187_v3 = vld [vmem:[%s1768_s1 + $0x278] sm:$0xff]  ;;  %v186_v4 = vld [vmem:[%s1768_s1 + $0x270] sm:$0xff] }
  0xb8   :  { %v828_v10 = vsel %vm780_vm0, %v708_v6, 0.0  ;;  %v830_v15 = vsel %vm780_vm0, %v709_v5, 0.0  ;;  %v719_v5 = vmul.f32 %v1373_v2, %v47_v62 }
  0xb9   :  { %v829_v59 = vadd.f32 %v828_v10, %v827_v8  ;;  %v49_v8 = vld [vmem:[%s1767_s0 + $0x128] sm:$0xff] }
  0xba   :  { %561 = vperm.xlu2 %1000, %v179_v9   ;;  %v48_v9 = vld [vmem:[%s1767_s0 + $0x120] sm:$0xff]  ;;  %v850_v2 = vsel %vm780_vm0, %v719_v5, 0.0 }
  0xbb   :  { %v831_v17 = vadd.f32 %v830_v15, %v829_v59  ;;  %556 = vperm.xlu1 %999, %v178_v12   ;;  %551 = vperm.xlu0 %998, %v177_v13   ;;  %v50_v15 = vld [vmem:[%s1767_s0 + $0x130] sm:$0xff] }
  0xbc   :  { %v1397_v20 = vpop.permute.xlu2 %396 }
  0xbd   :  { %v347_v21 = vpop.permute.xlu1 %346  ;;  %v342_v22 = vpop.permute.xlu0 %341  ;;  %v833_v26 = vadd.f32 %v832_v11, %v831_v17 }
  0xbe   :  { %v712_v23 = vmul.f32 %v347_v21, %v40_v18  ;;  %v711_v24 = vmul.f32 %v342_v22, %v39_v19  ;;  %v191_v18 = vld [vmem:[%s1768_s1 + $0x298] sm:$0xff]  ;;  %v190_v21 = vld [vmem:[%s1768_s1 + $0x290] sm:$0xff]  ;;  %v189_v22 = vld [vmem:[%s1768_s1 + $0x288] sm:$0xff] }
  0xc0   :  { %v834_v28 = vsel %vm780_vm0, %v711_v24, 0.0  ;;  %v836_v33 = vsel %vm780_vm0, %v712_v23, 0.0  ;;  %v722_v23 = vmul.f32 %v1397_v20, %v50_v15 }
  0xc1   :  { %v835_v16 = vadd.f32 %v834_v28, %v833_v26  ;;  %v52_v26 = vld [vmem:[%s1767_s0 + $0x140] sm:$0xff] }
  0xc2   :  { %576 = vperm.xlu2 %1000, %v182_v27   ;;  %v51_v27 = vld [vmem:[%s1767_s0 + $0x138] sm:$0xff]  ;;  %v856_v20 = vsel %vm780_vm0, %v722_v23, 0.0 }
  0xc3   :  { %v837_v34 = vadd.f32 %v836_v33, %v835_v16  ;;  %571 = vperm.xlu1 %999, %v181_v30   ;;  %566 = vperm.xlu0 %998, %v180_v31   ;;  %v53_v33 = vld [vmem:[%s1767_s0 + $0x148] sm:$0xff] }
  0xc4   :  { %v1421_v38 = vpop.permute.xlu2 %411 }
  0xc5   :  { %v362_v39 = vpop.permute.xlu1 %361  ;;  %v357_v40 = vpop.permute.xlu0 %356  ;;  %v839_v44 = vadd.f32 %v838_v29, %v837_v34 }
  0xc6   :  { %v715_v41 = vmul.f32 %v362_v39, %v43_v35  ;;  %v714_v42 = vmul.f32 %v357_v40, %v42_v36  ;;  %v194_v35 = vld [vmem:[%s1768_s1 + $0x2b0] sm:$0xff]  ;;  %v193_v39 = vld [vmem:[%s1768_s1 + $0x2a8] sm:$0xff]  ;;  %v192_v40 = vld [vmem:[%s1768_s1 + $0x2a0] sm:$0xff] }
  0xc8   :  { %v840_v46 = vsel %vm780_vm0, %v714_v42, 0.0  ;;  %v842_v52 = vsel %vm780_vm0, %v715_v41, 0.0  ;;  %v725_v41 = vmul.f32 %v1421_v38, %v53_v33 }
  0xc9   :  { %v841_v37 = vadd.f32 %v840_v46, %v839_v44  ;;  %v55_v44 = vld [vmem:[%s1767_s0 + $0x158] sm:$0xff] }
  0xca   :  { %591 = vperm.xlu2 %1000, %v185_v45   ;;  %v54_v45 = vld [vmem:[%s1767_s0 + $0x150] sm:$0xff]  ;;  %v862_v38 = vsel %vm780_vm0, %v725_v41, 0.0 }
  0xcb   :  { %v843_v53 = vadd.f32 %v842_v52, %v841_v37  ;;  %586 = vperm.xlu1 %999, %v184_v48   ;;  %581 = vperm.xlu0 %998, %v183_v50   ;;  %v56_v52 = vld [vmem:[%s1767_s0 + $0x160] sm:$0xff] }
  0xcc   :  { %v1445_v56 = vpop.permute.xlu2 %426 }
  0xcd   :  { %v377_v58 = vpop.permute.xlu1 %376  ;;  %v372_v60 = vpop.permute.xlu0 %371  ;;  %v845_v63 = vadd.f32 %v844_v47, %v843_v53 }
  0xce   :  { %v718_v49 = vmul.f32 %v377_v58, %v46_v54  ;;  %v717_v61 = vmul.f32 %v372_v60, %v45_v55  ;;  %v197_v54 = vld [vmem:[%s1768_s1 + $0x2c8] sm:$0xff]  ;;  %v196_v58 = vld [vmem:[%s1768_s1 + $0x2c0] sm:$0xff]  ;;  %v195_v60 = vld [vmem:[%s1768_s1 + $0x2b8] sm:$0xff] }
  0xd0   :  { %v846_v1 = vsel %vm780_vm0, %v717_v61, 0.0  ;;  %v848_v6 = vsel %vm780_vm0, %v718_v49, 0.0  ;;  %v728_v49 = vmul.f32 %v1445_v56, %v56_v52 }
  0xd1   :  { %v847_v57 = vadd.f32 %v846_v1, %v845_v63  ;;  %v58_v63 = vld [vmem:[%s1767_s0 + $0x170] sm:$0xff] }
  0xd2   :  { %606 = vperm.xlu2 %1000, %v188_v0   ;;  %v57_v0 = vld [vmem:[%s1767_s0 + $0x168] sm:$0xff]  ;;  %v868_v56 = vsel %vm780_vm0, %v728_v49, 0.0 }
  0xd3   :  { %v849_v7 = vadd.f32 %v848_v6, %v847_v57  ;;  %601 = vperm.xlu1 %999, %v187_v3   ;;  %596 = vperm.xlu0 %998, %v186_v4   ;;  %v59_v6 = vld [vmem:[%s1767_s0 + $0x178] sm:$0xff] }
  0xd4   :  { %v1469_v10 = vpop.permute.xlu2 %441 }
  0xd5   :  { %v392_v12 = vpop.permute.xlu1 %391  ;;  %v387_v13 = vpop.permute.xlu0 %386  ;;  %v851_v17 = vadd.f32 %v850_v2, %v849_v7 }
  0xd6   :  { %v721_v59 = vmul.f32 %v392_v12, %v49_v8  ;;  %v720_v14 = vmul.f32 %v387_v13, %v48_v9  ;;  %v200_v8 = vld [vmem:[%s1768_s1 + $0x2e0] sm:$0xff]  ;;  %v199_v12 = vld [vmem:[%s1768_s1 + $0x2d8] sm:$0xff]  ;;  %v198_v13 = vld [vmem:[%s1768_s1 + $0x2d0] sm:$0xff] }
  0xd8   :  { %v852_v19 = vsel %vm780_vm0, %v720_v14, 0.0  ;;  %v854_v24 = vsel %vm780_vm0, %v721_v59, 0.0  ;;  %v731_v59 = vmul.f32 %v1469_v10, %v59_v6 }
  0xd9   :  { %v853_v11 = vadd.f32 %v852_v19, %v851_v17  ;;  %v61_v17 = vld [vmem:[%s1767_s0 + $0x188] sm:$0xff] }
  0xda   :  { %621 = vperm.xlu2 %1000, %v191_v18   ;;  %v60_v18 = vld [vmem:[%s1767_s0 + $0x180] sm:$0xff] }
  0xdb   :  { %v855_v25 = vadd.f32 %v854_v24, %v853_v11  ;;  %616 = vperm.xlu1 %999, %v190_v21   ;;  %611 = vperm.xlu0 %998, %v189_v22   ;;  %v874_v11 = vsel %vm780_vm0, %v731_v59, 0.0  ;;  %v62_v24 = vld [vmem:[%s1767_s0 + $0x190] sm:$0xff] }
  0xdc   :  { %v1493_v28 = vpop.permute.xlu2 %456 }
  0xdd   :  { %v407_v30 = vpop.permute.xlu1 %406  ;;  %v402_v31 = vpop.permute.xlu0 %401  ;;  %v857_v34 = vadd.f32 %v856_v20, %v855_v25 }
  0xde   :  { %v724_v16 = vmul.f32 %v407_v30, %v52_v26  ;;  %v723_v32 = vmul.f32 %v402_v31, %v51_v27  ;;  %v203_v26 = vld [vmem:[%s1768_s1 + $0x2f8] sm:$0xff]  ;;  %v202_v30 = vld [vmem:[%s1768_s1 + $0x2f0] sm:$0xff]  ;;  %v201_v31 = vld [vmem:[%s1768_s1 + $0x2e8] sm:$0xff] }
  0xe0   :  { %v858_v36 = vsel %vm780_vm0, %v723_v32, 0.0  ;;  %v860_v42 = vsel %vm780_vm0, %v724_v16, 0.0  ;;  %v734_v16 = vmul.f32 %v1493_v28, %v62_v24 }
  0xe1   :  { %v859_v29 = vadd.f32 %v858_v36, %v857_v34  ;;  %v64_v34 = vld [vmem:[%s1767_s0 + $0x1a0] sm:$0xff] }
  0xe2   :  { %636 = vperm.xlu2 %1000, %v194_v35   ;;  %v63_v35 = vld [vmem:[%s1767_s0 + $0x198] sm:$0xff] }
  0xe3   :  { %v861_v43 = vadd.f32 %v860_v42, %v859_v29  ;;  %631 = vperm.xlu1 %999, %v193_v39   ;;  %626 = vperm.xlu0 %998, %v192_v40   ;;  %v880_v40 = vsel %vm780_vm0, %v734_v16, 0.0  ;;  %v65_v42 = vld [vmem:[%s1767_s0 + $0x1a8] sm:$0xff] }
  0xe4   :  { %v1517_v46 = vpop.permute.xlu2 %471 }
  0xe5   :  { %v422_v48 = vpop.permute.xlu1 %421  ;;  %v417_v50 = vpop.permute.xlu0 %416  ;;  %v863_v53 = vadd.f32 %v862_v38, %v861_v43 }
  0xe6   :  { %v727_v37 = vmul.f32 %v422_v48, %v55_v44  ;;  %v726_v51 = vmul.f32 %v417_v50, %v54_v45  ;;  %v737_v48 = vmul.f32 %v1517_v46, %v65_v42  ;;  %v68_v46 = vld [vmem:[%s1767_s0 + $0x1c0] sm:$0xff] }
  0xe8   :  { %v864_v55 = vsel %vm780_vm0, %v726_v51, 0.0  ;;  %v866_v61 = vsel %vm780_vm0, %v727_v37, 0.0  ;;  %v67_v37 = vld [vmem:[%s1767_s0 + $0x1b8] sm:$0xff]  ;;  %v66_v51 = vld [vmem:[%s1767_s0 + $0x1b0] sm:$0xff] }
  0xe9   :  { %v865_v47 = vadd.f32 %v864_v55, %v863_v53 }
  0xea   :  { %651 = vperm.xlu2 %1000, %v197_v54   ;;  %v886_v54 = vsel %vm780_vm0, %v737_v48, 0.0 }
  0xeb   :  { %v867_v62 = vadd.f32 %v866_v61, %v865_v47  ;;  %646 = vperm.xlu1 %999, %v196_v58   ;;  %641 = vperm.xlu0 %998, %v195_v60  }
  0xec   :  { %v1541_v1 = vpop.permute.xlu2 %486 }
  0xed   :  { %v437_v3 = vpop.permute.xlu1 %436  ;;  %v432_v4 = vpop.permute.xlu0 %431  ;;  %v869_v7 = vadd.f32 %v868_v56, %v867_v62  ;;  %v740_v62 = vmul.f32 %v1541_v1, %v68_v46  ;;  %v71_v1 = vld [vmem:[%s1767_s0 + $0x1d8] sm:$0xff] }
  0xee   :  { %v730_v57 = vmul.f32 %v437_v3, %v58_v63  ;;  %v729_v5 = vmul.f32 %v432_v4, %v57_v0  ;;  %v70_v3 = vld [vmem:[%s1767_s0 + $0x1d0] sm:$0xff]  ;;  %v69_v4 = vld [vmem:[%s1767_s0 + $0x1c8] sm:$0xff] }
  0xf0   :  { %v870_v9 = vsel %vm780_vm0, %v729_v5, 0.0  ;;  %v872_v14 = vsel %vm780_vm0, %v730_v57, 0.0  ;;  %v892_v5 = vsel %vm780_vm0, %v740_v62, 0.0 }
  0xf1   :  { %v871_v2 = vadd.f32 %v870_v9, %v869_v7 }
  0xf2   :  { %666 = vperm.xlu2 %1000, %v200_v8  }
  0xf3   :  { %v873_v15 = vadd.f32 %v872_v14, %v871_v2  ;;  %661 = vperm.xlu1 %999, %v199_v12   ;;  %656 = vperm.xlu0 %998, %v198_v13  }
  0xf4   :  { %v502_v19 = vpop.permute.xlu2 %501 }
  0xf5   :  { %v452_v21 = vpop.permute.xlu1 %451  ;;  %v447_v22 = vpop.permute.xlu0 %446  ;;  %v875_v25 = vadd.f32 %v874_v11, %v873_v15  ;;  %v743_v13 = vmul.f32 %v502_v19, %v71_v1  ;;  %v73_v15 = vld [vmem:[%s1767_s0 + $0x1e8] sm:$0xff]  ;;  %v74_v19 = vld [vmem:[%s1767_s0 + $0x1f0] sm:$0xff] }
  0xf6   :  { %v733_v10 = vmul.f32 %v452_v21, %v61_v17  ;;  %v732_v23 = vmul.f32 %v447_v22, %v60_v18  ;;  %v72_v17 = vld [vmem:[%s1767_s0 + $0x1e0] sm:$0xff] }
  0xf7   :  { %v898_v22 = vsel %vm780_vm0, %v743_v13, 0.0  ;;  %v84_v13 = vld [vmem:[%s1767_s0 + $0x240] sm:$0xff] }
  0xf8   :  { %v876_v27 = vsel %vm780_vm0, %v732_v23, 0.0  ;;  %v878_v32 = vsel %vm780_vm0, %v733_v10, 0.0 }
  0xf9   :  { %v877_v20 = vadd.f32 %v876_v27, %v875_v25 }
  0xfa   :  { %681 = vperm.xlu2 %1000, %v203_v26  }
  0xfb   :  { %v879_v33 = vadd.f32 %v878_v32, %v877_v20  ;;  %676 = vperm.xlu1 %999, %v202_v30   ;;  %671 = vperm.xlu0 %998, %v201_v31   ;;  %v76_v31 = vld [vmem:[%s1767_s0 + $0x200] sm:$0xff]  ;;  %v75_v20 = vld [vmem:[%s1767_s0 + $0x1f8] sm:$0xff] }
  0xfc   :  { %v517_v29 = vpop.permute.xlu2 %516 }
  0xfd   :  { %v467_v36 = vpop.permute.xlu1 %466  ;;  %v462_v39 = vpop.permute.xlu0 %461  ;;  %v881_v43 = vadd.f32 %v880_v40, %v879_v33  ;;  %v746_v26 = vmul.f32 %v517_v29, %v74_v19 }
  0xfe   :  { %v736_v28 = vmul.f32 %v467_v36, %v64_v34  ;;  %v735_v41 = vmul.f32 %v462_v39, %v63_v35  ;;  %v77_v39 = vld [vmem:[%s1767_s0 + $0x208] sm:$0xff] }
  0xff   :  { %v904_v34 = vsel %vm780_vm0, %v746_v26, 0.0  ;;  %v87_v26 = vld [vmem:[%s1767_s0 + $0x258] sm:$0xff] }
 0x100   :  { %v882_v44 = vsel %vm780_vm0, %v735_v41, 0.0  ;;  %v884_v50 = vsel %vm780_vm0, %v736_v28, 0.0 }
 0x101   :  { %v883_v45 = vadd.f32 %v882_v44, %v881_v43  ;;  %v79_v44 = vld [vmem:[%s1767_s0 + $0x218] sm:$0xff] }
 0x103   :  { %v885_v38 = vadd.f32 %v884_v50, %v883_v45  ;;  %v78_v45 = vld [vmem:[%s1767_s0 + $0x210] sm:$0xff] }
 0x104   :  { %v532_v47 = vpop.permute.xlu2 %531 }
 0x105   :  { %v482_v52 = vpop.permute.xlu1 %481  ;;  %v477_v53 = vpop.permute.xlu0 %476  ;;  %v887_v60 = vadd.f32 %v886_v54, %v885_v38  ;;  %v749_v41 = vmul.f32 %v532_v47, %v77_v39 }
 0x106   :  { %v739_v55 = vmul.f32 %v482_v52, %v67_v37  ;;  %v738_v58 = vmul.f32 %v477_v53, %v66_v51  ;;  %v80_v53 = vld [vmem:[%s1767_s0 + $0x220] sm:$0xff] }
 0x107   :  { %v910_v38 = vsel %vm780_vm0, %v749_v41, 0.0 }
 0x108   :  { %v888_v49 = vsel %vm780_vm0, %v738_v58, 0.0  ;;  %v890_v63 = vsel %vm780_vm0, %v739_v55, 0.0 }
 0x109   :  { %v889_v61 = vadd.f32 %v888_v49, %v887_v60  ;;  %v82_v49 = vld [vmem:[%s1767_s0 + $0x230] sm:$0xff] }
 0x10b   :  { %v891_v0 = vadd.f32 %v890_v63, %v889_v61  ;;  %v81_v61 = vld [vmem:[%s1767_s0 + $0x228] sm:$0xff] }
 0x10c   :  { %v547_v2 = vpop.permute.xlu2 %546 }
 0x10d   :  { %v497_v56 = vpop.permute.xlu1 %496  ;;  %v492_v57 = vpop.permute.xlu0 %491  ;;  %v893_v8 = vadd.f32 %v892_v5, %v891_v0  ;;  %v752_v46 = vmul.f32 %v547_v2, %v80_v53 }
 0x10e   :  { %v742_v6 = vmul.f32 %v497_v56, %v70_v3  ;;  %v741_v7 = vmul.f32 %v492_v57, %v69_v4  ;;  %v83_v56 = vld [vmem:[%s1767_s0 + $0x238] sm:$0xff] }
 0x10f   :  { %v916_v0 = vsel %vm780_vm0, %v752_v46, 0.0 }
 0x110   :  { %v894_v9 = vsel %vm780_vm0, %v741_v7, 0.0  ;;  %v896_v59 = vsel %vm780_vm0, %v742_v6, 0.0 }
 0x111   :  { %v895_v12 = vadd.f32 %v894_v9, %v893_v8 }
 0x113   :  { %v897_v14 = vadd.f32 %v896_v59, %v895_v12  ;;  %v85_v12 = vld [vmem:[%s1767_s0 + $0x248] sm:$0xff] }
 0x114   :  { %v562_v16 = vpop.permute.xlu2 %561 }
 0x115   :  { %v512_v18 = vpop.permute.xlu1 %511  ;;  %v507_v21 = vpop.permute.xlu0 %506  ;;  %v899_v23 = vadd.f32 %v898_v22, %v897_v14  ;;  %v755_v1 = vmul.f32 %v562_v16, %v83_v56 }
 0x116   :  { %v745_v11 = vmul.f32 %v512_v18, %v73_v15  ;;  %v744_v10 = vmul.f32 %v507_v21, %v72_v17  ;;  %v86_v18 = vld [vmem:[%s1767_s0 + $0x250] sm:$0xff] }
 0x117   :  { %v922_v14 = vsel %vm780_vm0, %v755_v1, 0.0 }
 0x118   :  { %v900_v24 = vsel %vm780_vm0, %v744_v10, 0.0  ;;  %v902_v27 = vsel %vm780_vm0, %v745_v11, 0.0 }
 0x119   :  { %v901_v25 = vadd.f32 %v900_v24, %v899_v23 }
 0x11b   :  { %v903_v30 = vadd.f32 %v902_v27, %v901_v25  ;;  %v88_v25 = vld [vmem:[%s1767_s0 + $0x260] sm:$0xff] }
 0x11c   :  { %v577_v37 = vpop.permute.xlu2 %576 }
 0x11d   :  { %v527_v32 = vpop.permute.xlu1 %526  ;;  %v522_v33 = vpop.permute.xlu0 %521  ;;  %v905_v40 = vadd.f32 %v904_v34, %v903_v30  ;;  %v758_v10 = vmul.f32 %v577_v37, %v86_v18 }
 0x11e   :  { %v748_v35 = vmul.f32 %v527_v32, %v76_v31  ;;  %v747_v36 = vmul.f32 %v522_v33, %v75_v20  ;;  %v89_v32 = vld [vmem:[%s1767_s0 + $0x268] sm:$0xff] }
 0x11f   :  { %v928_v31 = vsel %vm780_vm0, %v758_v10, 0.0  ;;  %v99_v10 = vld [vmem:[%s1767_s0 + $0x2b8] sm:$0xff] }
 0x120   :  { %v906_v29 = vsel %vm780_vm0, %v747_v36, 0.0  ;;  %v908_v42 = vsel %vm780_vm0, %v748_v35, 0.0 }
 0x121   :  { %v907_v28 = vadd.f32 %v906_v29, %v905_v40  ;;  %v91_v29 = vld [vmem:[%s1767_s0 + $0x278] sm:$0xff] }
 0x123   :  { %v909_v43 = vadd.f32 %v908_v42, %v907_v28  ;;  %v90_v28 = vld [vmem:[%s1767_s0 + $0x270] sm:$0xff] }
 0x124   :  { %v592_v5 = vpop.permute.xlu2 %591 }
 0x125   :  { %v542_v48 = vpop.permute.xlu1 %541  ;;  %v537_v50 = vpop.permute.xlu0 %536  ;;  %v911_v54 = vadd.f32 %v910_v38, %v909_v43  ;;  %v761_v36 = vmul.f32 %v592_v5, %v89_v32 }
 0x126   :  { %v751_v51 = vmul.f32 %v542_v48, %v79_v44  ;;  %v750_v52 = vmul.f32 %v537_v50, %v78_v45  ;;  %v92_v50 = vld [vmem:[%s1767_s0 + $0x280] sm:$0xff] }
 0x127   :  { %v934_v44 = vsel %vm780_vm0, %v761_v36, 0.0  ;;  %v102_v36 = vld [vmem:[%s1767_s0 + $0x2d0] sm:$0xff] }
 0x128   :  { %v912_v55 = vsel %vm780_vm0, %v750_v52, 0.0  ;;  %v914_v60 = vsel %vm780_vm0, %v751_v51, 0.0 }
 0x129   :  { %v913_v58 = vadd.f32 %v912_v55, %v911_v54  ;;  %v94_v55 = vld [vmem:[%s1767_s0 + $0x290] sm:$0xff] }
 0x12b   :  { %v915_v47 = vadd.f32 %v914_v60, %v913_v58  ;;  %v93_v58 = vld [vmem:[%s1767_s0 + $0x288] sm:$0xff] }
 0x12c   :  { %v607_v19 = vpop.permute.xlu2 %606 }
 0x12d   :  { %v557_v62 = vpop.permute.xlu1 %556  ;;  %v552_v63 = vpop.permute.xlu0 %551  ;;  %v917_v57 = vadd.f32 %v916_v0, %v915_v47  ;;  %v764_v52 = vmul.f32 %v607_v19, %v92_v50 }
 0x12e   :  { %v754_v3 = vmul.f32 %v557_v62, %v82_v49  ;;  %v753_v4 = vmul.f32 %v552_v63, %v81_v61  ;;  %v95_v63 = vld [vmem:[%s1767_s0 + $0x298] sm:$0xff] }
 0x12f   :  { %v940_v47 = vsel %vm780_vm0, %v764_v52, 0.0 }
 0x130   :  { %v918_v6 = vsel %vm780_vm0, %v753_v4, 0.0  ;;  %v920_v8 = vsel %vm780_vm0, %v754_v3, 0.0 }
 0x131   :  { %v919_v7 = vadd.f32 %v918_v6, %v917_v57  ;;  %v97_v6 = vld [vmem:[%s1767_s0 + $0x2a8] sm:$0xff] }
 0x133   :  { %v921_v9 = vadd.f32 %v920_v8, %v919_v7  ;;  %v96_v7 = vld [vmem:[%s1767_s0 + $0x2a0] sm:$0xff] }
 0x134   :  { %v622_v41 = vpop.permute.xlu2 %621 }
 0x135   :  { %v572_v2 = vpop.permute.xlu1 %571  ;;  %v567_v59 = vpop.permute.xlu0 %566  ;;  %v923_v21 = vadd.f32 %v922_v14, %v921_v9  ;;  %v767_v56 = vmul.f32 %v622_v41, %v95_v63 }
 0x136   :  { %v757_v15 = vmul.f32 %v572_v2, %v85_v12  ;;  %v756_v17 = vmul.f32 %v567_v59, %v84_v13  ;;  %v98_v2 = vld [vmem:[%s1767_s0 + $0x2b0] sm:$0xff] }
 0x137   :  { %v946_v9 = vsel %vm780_vm0, %v767_v56, 0.0 }
 0x138   :  { %v924_v22 = vsel %vm780_vm0, %v756_v17, 0.0  ;;  %v926_v23 = vsel %vm780_vm0, %v757_v15, 0.0 }
 0x139   :  { %v925_v11 = vadd.f32 %v924_v22, %v923_v21 }
 0x13b   :  { %v927_v24 = vadd.f32 %v926_v23, %v925_v11  ;;  %v100_v11 = vld [vmem:[%s1767_s0 + $0x2c0] sm:$0xff] }
 0x13c   :  { %v637_v49 = vpop.permute.xlu2 %636 }
 0x13d   :  { %v587_v27 = vpop.permute.xlu1 %586  ;;  %v582_v30 = vpop.permute.xlu0 %581  ;;  %v929_v33 = vadd.f32 %v928_v31, %v927_v24  ;;  %v770_v18 = vmul.f32 %v637_v49, %v98_v2 }
 0x13e   :  { %v760_v20 = vmul.f32 %v587_v27, %v88_v25  ;;  %v759_v16 = vmul.f32 %v582_v30, %v87_v26  ;;  %v101_v27 = vld [vmem:[%s1767_s0 + $0x2c8] sm:$0xff] }
 0x13f   :  { %v952_v24 = vsel %vm780_vm0, %v770_v18, 0.0 }
 0x140   :  { %v930_v34 = vsel %vm780_vm0, %v759_v16, 0.0  ;;  %v932_v39 = vsel %vm780_vm0, %v760_v20, 0.0 }
 0x141   :  { %v931_v35 = vadd.f32 %v930_v34, %v929_v33 }
 0x143   :  { %v933_v40 = vadd.f32 %v932_v39, %v931_v35  ;;  %v103_v35 = vld [vmem:[%s1767_s0 + $0x2d8] sm:$0xff] }
 0x144   :  { %v652_v14 = vpop.permute.xlu2 %651 }
 0x145   :  { %v602_v42 = vpop.permute.xlu1 %601  ;;  %v597_v43 = vpop.permute.xlu0 %596  ;;  %v935_v38 = vadd.f32 %v934_v44, %v933_v40  ;;  %v773_v16 = vmul.f32 %v652_v14, %v101_v27 }
 0x146   :  { %v763_v45 = vmul.f32 %v602_v42, %v91_v29  ;;  %v762_v48 = vmul.f32 %v597_v43, %v90_v28  ;;  %v104_v42 = vld [vmem:[%s1767_s0 + $0x2e0] sm:$0xff] }
 0x147   :  { %v958_v29 = vsel %vm780_vm0, %v773_v16, 0.0 }
 0x148   :  { %v936_v37 = vsel %vm780_vm0, %v762_v48, 0.0  ;;  %v938_v53 = vsel %vm780_vm0, %v763_v45, 0.0 }
 0x149   :  { %v937_v51 = vadd.f32 %v936_v37, %v935_v38  ;;  %v106_v37 = vld [vmem:[%s1767_s0 + $0x2f0] sm:$0xff] }
 0x14b   :  { %v939_v54 = vadd.f32 %v938_v53, %v937_v51  ;;  %v105_v51 = vld [vmem:[%s1767_s0 + $0x2e8] sm:$0xff]  ;;  %v107_v53 = vld [vmem:[%s1767_s0 + $0x2f8] sm:$0xff]  ;;  %s1028_s0 = smov [#allocation2]  }
 0x14c   :  { %v667_v32 = vpop.permute.xlu2 %666  ;;  %s985_s26 = sshll.u32 %s1028_s0, 4  ;;  %s986_s26 = int_to_ptr.vmem [resolvable:$true] %s985_s26 }
 0x14d   :  { %v617_v46 = vpop.permute.xlu1 %616  ;;  %v612_v60 = vpop.permute.xlu0 %611  ;;  %v941_v0 = vadd.f32 %v940_v47, %v939_v54  ;;  %v776_v48 = vmul.f32 %v667_v32, %v104_v42 }
 0x14e   :  { %v766_v61 = vmul.f32 %v617_v46, %v94_v55  ;;  %v765_v62 = vmul.f32 %v612_v60, %v93_v58 }
 0x14f   :  { %v964_v58 = vsel %vm780_vm0, %v776_v48, 0.0 }
 0x150   :  { %v942_v3 = vsel %vm780_vm0, %v765_v62, 0.0  ;;  %v944_v57 = vsel %vm780_vm0, %v766_v61, 0.0 }
 0x151   :  { %v943_v4 = vadd.f32 %v942_v3, %v941_v0 }
 0x153   :  { %v945_v5 = vadd.f32 %v944_v57, %v943_v4 }
 0x154   :  { %v682_v52 = vpop.permute.xlu2 %681 }
 0x155   :  { %v632_v1 = vpop.permute.xlu1 %631  ;;  %v627_v8 = vpop.permute.xlu0 %626  ;;  %v947_v59 = vadd.f32 %v946_v9, %v945_v5  ;;  %v779_v49 = vmul.f32 %v682_v52, %v107_v53 }
 0x156   :  { %v769_v12 = vmul.f32 %v632_v1, %v97_v6  ;;  %v768_v13 = vmul.f32 %v627_v8, %v96_v7 }
 0x157   :  { %v970_v3 = vsel %vm780_vm0, %v779_v49, 0.0 }
 0x158   :  { %v948_v15 = vsel %vm780_vm0, %v768_v13, 0.0  ;;  %v950_v21 = vsel %vm780_vm0, %v769_v12, 0.0 }
 0x159   :  { %v949_v17 = vadd.f32 %v948_v15, %v947_v59 }
 0x15b   :  { %v951_v22 = vadd.f32 %v950_v21, %v949_v17 }
 0x15d   :  { %v647_v19 = vpop.permute.xlu1 %646  ;;  %v642_v23 = vpop.permute.xlu0 %641  ;;  %v953_v30 = vadd.f32 %v952_v24, %v951_v22 }
 0x15e   :  { %v772_v25 = vmul.f32 %v647_v19, %v100_v11  ;;  %v771_v26 = vmul.f32 %v642_v23, %v99_v10 }
 0x160   :  { %v954_v31 = vsel %vm780_vm0, %v771_v26, 0.0  ;;  %v956_v33 = vsel %vm780_vm0, %v772_v25, 0.0 }
 0x161   :  { %v955_v20 = vadd.f32 %v954_v31, %v953_v30 }
 0x163   :  { %v957_v34 = vadd.f32 %v956_v33, %v955_v20 }
 0x165   :  { %v662_v39 = vpop.permute.xlu1 %661  ;;  %v657_v40 = vpop.permute.xlu0 %656  ;;  %v959_v43 = vadd.f32 %v958_v29, %v957_v34 }
 0x166   :  { %v775_v28 = vmul.f32 %v662_v39, %v103_v35  ;;  %v774_v41 = vmul.f32 %v657_v40, %v102_v36 }
 0x168   :  { %v960_v44 = vsel %vm780_vm0, %v774_v41, 0.0  ;;  %v962_v50 = vsel %vm780_vm0, %v775_v28, 0.0 }
 0x169   :  { %v961_v45 = vadd.f32 %v960_v44, %v959_v43 }
 0x16b   :  { %v963_v38 = vadd.f32 %v962_v50, %v961_v45 }
 0x16d   :  { %v677_v54 = vpop.permute.xlu1 %676  ;;  %v672_v55 = vpop.permute.xlu0 %671  ;;  %v965_v47 = vadd.f32 %v964_v58, %v963_v38 }
 0x16e   :  { %v778_v46 = vmul.f32 %v677_v54, %v106_v37  ;;  %v777_v60 = vmul.f32 %v672_v55, %v105_v51 }
 0x170   :  { %v966_v61 = vsel %vm780_vm0, %v777_v60, 0.0  ;;  %v968_v63 = vsel %vm780_vm0, %v778_v46, 0.0 }
 0x171   :  { %v967_v62 = vadd.f32 %v966_v61, %v965_v47 }
 0x173   :  { %v969_v0 = vadd.f32 %v968_v63, %v967_v62 }
 0x175   :  { %v971_v4 = vadd.f32 %v970_v3, %v969_v0 }
 0x177   :  { %v972_v56 = vrot.slane %v971_v4, 4 }
 0x179   :  { %v973_v57 = vadd.f32 %v972_v56, %v971_v4 }
 0x17b   :  { %v974_v5 = vrot.slane %v973_v57, 2 }
 0x17d   :  { %v975_v6 = vadd.f32 %v974_v5, %v973_v57 }
 0x17f   :  { %v976_v7 = vrot.slane %v975_v6, 1 }
 0x181   :  { %v977_v1 = vadd.f32 %v976_v7, %v975_v6 }
 0x183   :  { %979 = vst.msk [vmem:[#allocation2] sm:$0x1] %vm978_vm1, %v977_v1 }
 0x184   :  { %990 = dma.vmem_to_hbm [thread:$0]  %s986_s26, 16, %s988_s28, [#allocation3]  }
 0x185   :  { %1025 = dma.done.wait [#allocation3], 16  }
 0x186   :  { %1026 = vsyncadd [#allocation3], 4294967280 }
 0x187   :  { %995 = vsyncpa [#allocation3], 1 }

</bundles_post_ra>
